<compile_context>
chip_gen: v7x
topology: tpu7x:2x2x1
jax: 0.10.0
libtpu: 0.0.40
codegen_flags: <defaults>
</compile_context>

<pallas_src>
import functools

import jax
import jax.numpy as jnp
from jax.experimental import pallas as pl
from jax.experimental.pallas import tpu as pltpu

GAMMA = 2.0
ALPHA = 0.25
LANES = 128  # lane width of the flattened view (native vreg lane extent)


def _focal_loss_kernel(pred_ref, tgt_ref, out_ref, acc_ref, *, gamma, alpha,
                       total_elems, tile_rows, inner_steps, apply_mask):
    k = pl.program_id(1)

    @pl.when(k == 0)
    def _():
        acc_ref[...] = jnp.zeros_like(acc_ref)

    x = pred_ref[...].astype(jnp.float32)
    t = tgt_ref[...].astype(jnp.float32)

    # Shared exponential for BCE-with-logits and sigmoid.
    e = jnp.exp(-jnp.abs(x))                           # EUP: exp (once)

    # BCEWithLogitsLoss(reduction='none'), numerically stable:
    #   max(x, 0) - x*t + log(1 + exp(-|x|))
    bce = jnp.maximum(x, 0.0) - x * t + jnp.log1p(e)   # EUP: log (once)

    # sigmoid(x) = 1/(1+e) for x >= 0, e/(1+e) for x < 0   (e = exp(-|x|)).
    denom = 1.0 + e
    inv = pl.reciprocal(denom, approx=True)            # EUP: approx recip
    inv = inv * (2.0 - denom * inv)                    # one Newton step (VPU)
    p = jnp.where(x >= 0.0, inv, e * inv)

    p_t = t * p + (1.0 - t) * (1.0 - p)

    loss = bce
    if gamma:  # static (trace-time) specialisation; gamma==0 -> factor 1.0
        one_minus_pt = 1.0 - p_t
        if float(gamma) == 2.0:
            modulating = one_minus_pt * one_minus_pt   # avoid power -> exp+log
        else:
            modulating = jnp.power(one_minus_pt, jnp.float32(gamma))
        loss = modulating * loss
    if alpha is not None:
        loss = (t * alpha + (1.0 - t) * (1.0 - alpha)) * loss

    if apply_mask:
        # Zero out the contribution of the zero-padded tail.
        # NOTE: int32 flat index limits this masked path to < 2**31 elements.
        block_idx = pl.program_id(0) * inner_steps + k
        rows = jax.lax.broadcasted_iota(jnp.int32, loss.shape, 0)
        cols = jax.lax.broadcasted_iota(jnp.int32, loss.shape, 1)
        flat_idx = (block_idx * tile_rows + rows) * LANES + cols
        loss = jnp.where(flat_idx < total_elems, loss, 0.0)

    # Fold tile rows into the (8, 128) accumulator: the reshape only splits
    # the sublane axis (no lane relayout), so this is pure VPU adds.
    acc_ref[...] += loss.reshape(tile_rows // 8, 8, LANES).sum(axis=0)

    @pl.when(k == pl.num_programs(1) - 1)
    def _():
        out_ref[0] = acc_ref[...]


def focal_loss(prediction, target, *, gamma=GAMMA, alpha=ALPHA,
               tile_rows=2048, num_partitions=2):
    """Mean sigmoid focal loss over [B, A, C] logits / one-hot targets.

    Inputs may be f32 or bf16 (bf16 halves HBM traffic; the kernel computes
    in f32 either way).
    """
    assert prediction.shape == target.shape
    total = int(prediction.size)

    # Shrink the tile for tiny inputs so we don't pad absurdly; keep the
    # sublane granularity of 8 rows.
    min_rows = -(-total // LANES)
    tile_rows = max(8, min(tile_rows, ((min_rows + 7) // 8) * 8))

    chunk = num_partitions * tile_rows * LANES
    padded_total = ((total + chunk - 1) // chunk) * chunk
    pad = padded_total - total

    pred_flat = prediction.reshape(-1)
    tgt_flat = target.reshape(-1)
    if pad:
        pred_flat = jnp.pad(pred_flat, (0, pad))
        tgt_flat = jnp.pad(tgt_flat, (0, pad))

    rows = padded_total // LANES
    pred2d = pred_flat.reshape(rows, LANES)
    tgt2d = tgt_flat.reshape(rows, LANES)

    inner_steps = rows // (tile_rows * num_partitions)

    kernel = functools.partial(
        _focal_loss_kernel,
        gamma=gamma, alpha=alpha, total_elems=total,
        tile_rows=tile_rows, inner_steps=inner_steps, apply_mask=pad > 0)

    in_spec = pl.BlockSpec((tile_rows, LANES),
                           lambda p, k: (p * inner_steps + k, 0))

    partials = pl.pallas_call(
        kernel,
        out_shape=jax.ShapeDtypeStruct((num_partitions, 8, LANES), jnp.float32),
        grid_spec=pltpu.PrefetchScalarGridSpec(
            num_scalar_prefetch=0,
            grid=(num_partitions, inner_steps),
            in_specs=[in_spec, in_spec],
            out_specs=pl.BlockSpec((1, 8, LANES), lambda p, k: (p, 0, 0)),
            scratch_shapes=[pltpu.VMEM((8, LANES), jnp.float32)],
        ),
        compiler_params=pltpu.CompilerParams(
            dimension_semantics=("parallel", "arbitrary"),
        ),
    )(pred2d, tgt2d)

    # Final tiny reduction (P*8*128 floats) + mean in plain JAX.
    return jnp.sum(partials) / jnp.float32(total)


def _reference_focal_loss(prediction, target, gamma=GAMMA, alpha=ALPHA):
    x = prediction.astype(jnp.float32)
    t = target.astype(jnp.float32)
    bce = jnp.maximum(x, 0.0) - x * t + jnp.log1p(jnp.exp(-jnp.abs(x)))
    p = jax.nn.sigmoid(x)
    p_t = t * p + (1.0 - t) * (1.0 - p)
    mod = jnp.power(1.0 - p_t, gamma) if gamma else 1.0
    aw = (t * alpha + (1.0 - t) * (1.0 - alpha)) if alpha is not None else 1.0
    return jnp.mean(mod * aw * bce)


if __name__ == "__main__":
    key = jax.random.PRNGKey(0)
    k1, k2 = jax.random.split(key)

    # [batch_size, num_anchors, num_classes]
    B, A, C = 2, 64, 8
    prediction = jax.random.normal(k1, (B, A, C), dtype=jnp.float32) * 2.0
    target = (jax.random.uniform(k2, (B, A, C)) < 0.25).astype(jnp.float32)

    loss = focal_loss(prediction, target)
    loss = jax.block_until_ready(loss)

    ref = _reference_focal_loss(prediction, target)
    assert jnp.allclose(loss, ref, rtol=1e-4, atol=1e-6), (loss, ref)

    print("KERNEL_OK")
</pallas_src>

<mosaic_0001>
module attributes {stable_mosaic.version = 11 : i64} {
  func.func @_focal_loss_kernel(%arg0: i32, %arg1: i32, %arg2: memref<8x128xf32, #tpu.memory_space<vmem>>, %arg3: memref<8x128xf32, #tpu.memory_space<vmem>>, %arg4: memref<1x8x128xf32, #tpu.memory_space<vmem>>, %arg5: memref<8x128xf32, #tpu.memory_space<vmem>>) attributes {dimension_semantics = [#tpu.dimension_semantics<parallel>, #tpu.dimension_semantics<arbitrary>], iteration_bounds = array<i64: 2, 1>, scalar_prefetch = 0 : i64, scratch_operands = 1 : i64, tpu.core_type = #tpu.core_type<tc>, window_params = [{transform_indices = @transform_0, window_bounds = array<i64: 8, 128>}, {transform_indices = @transform_1, window_bounds = array<i64: 8, 128>}, {transform_indices = @transform_2, window_bounds = array<i64: 1, 8, 128>}]} {
    %c0_i32 = arith.constant 0 : i32
    %0 = arith.cmpi eq, %arg1, %c0_i32 : i32
    %1 = arith.extui %0 : i1 to i32
    %c0_i32_0 = arith.constant 0 : i32
    %2 = arith.cmpi ne, %1, %c0_i32_0 : i32
    scf.if %2 {
      %cst_22 = arith.constant 0.000000e+00 : f32
      %67 = vector.broadcast %cst_22 : f32 to vector<8x128xf32>
      %c0_23 = arith.constant 0 : index
      %c0_24 = arith.constant 0 : index
      %68 = vector.load %arg5[%c0_23, %c0_24] : memref<8x128xf32, #tpu.memory_space<vmem>>, vector<8x128xf32>
      tpu.vector_store %arg5[%c0_23, %c0_24], %67 {strides = array<i32>} : memref<8x128xf32, #tpu.memory_space<vmem>>, vector<8x128xf32>,
    } else {
    }
    %c0 = arith.constant 0 : index
    %c0_1 = arith.constant 0 : index
    %3 = vector.load %arg2[%c0, %c0_1] : memref<8x128xf32, #tpu.memory_space<vmem>>, vector<8x128xf32>
    %c0_2 = arith.constant 0 : index
    %c0_3 = arith.constant 0 : index
    %4 = vector.load %arg3[%c0_2, %c0_3] : memref<8x128xf32, #tpu.memory_space<vmem>>, vector<8x128xf32>
    %5 = math.absf %3 : vector<8x128xf32>
    %cst = arith.constant 0.000000e+00 : f32
    %6 = vector.broadcast %cst : f32 to vector<8x128xf32>
    %7 = arith.subf %6, %5 : vector<8x128xf32>
    %8 = math.exp %7 : vector<8x128xf32>
    %cst_4 = arith.constant 0.000000e+00 : f32
    %9 = vector.broadcast %cst_4 : f32 to vector<8x128xf32>
    %10 = arith.maximumf %3, %9 : vector<8x128xf32>
    %11 = arith.mulf %3, %4 : vector<8x128xf32>
    %12 = arith.subf %10, %11 : vector<8x128xf32>
    %13 = math.log1p %8 : vector<8x128xf32>
    %14 = arith.addf %12, %13 : vector<8x128xf32>
    %cst_5 = arith.constant 1.000000e+00 : f32
    %15 = vector.broadcast %cst_5 : f32 to vector<8x128xf32>
    %16 = arith.addf %15, %8 : vector<8x128xf32>
    %17 = tpu.reciprocal %16 {approx = true} : vector<8x128xf32> -> vector<8x128xf32>
    %18 = arith.mulf %16, %17 : vector<8x128xf32>
    %cst_6 = arith.constant 2.000000e+00 : f32
    %19 = vector.broadcast %cst_6 : f32 to vector<8x128xf32>
    %20 = arith.subf %19, %18 : vector<8x128xf32>
    %21 = arith.mulf %17, %20 : vector<8x128xf32>
    %cst_7 = arith.constant 0.000000e+00 : f32
    %22 = vector.broadcast %cst_7 : f32 to vector<8x128xf32>
    %23 = arith.cmpf oge, %3, %22 : vector<8x128xf32>
    %24 = arith.mulf %8, %21 : vector<8x128xf32>
    %25 = arith.select %23, %21, %24 : vector<8x128xi1>, vector<8x128xf32>
    %26 = arith.mulf %4, %25 : vector<8x128xf32>
    %cst_8 = arith.constant 1.000000e+00 : f32
    %27 = vector.broadcast %cst_8 : f32 to vector<8x128xf32>
    %28 = arith.subf %27, %4 : vector<8x128xf32>
    %cst_9 = arith.constant 1.000000e+00 : f32
    %29 = vector.broadcast %cst_9 : f32 to vector<8x128xf32>
    %30 = arith.subf %29, %25 : vector<8x128xf32>
    %31 = arith.mulf %28, %30 : vector<8x128xf32>
    %32 = arith.addf %26, %31 : vector<8x128xf32>
    %cst_10 = arith.constant 1.000000e+00 : f32
    %33 = vector.broadcast %cst_10 : f32 to vector<8x128xf32>
    %34 = arith.subf %33, %32 : vector<8x128xf32>
    %35 = arith.mulf %34, %34 : vector<8x128xf32>
    %36 = arith.mulf %35, %14 : vector<8x128xf32>
    %cst_11 = arith.constant 2.500000e-01 : f32
    %37 = vector.broadcast %cst_11 : f32 to vector<8x128xf32>
    %38 = arith.mulf %4, %37 : vector<8x128xf32>
    %cst_12 = arith.constant 1.000000e+00 : f32
    %39 = vector.broadcast %cst_12 : f32 to vector<8x128xf32>
    %40 = arith.subf %39, %4 : vector<8x128xf32>
    %cst_13 = arith.constant 7.500000e-01 : f32
    %41 = vector.broadcast %cst_13 : f32 to vector<8x128xf32>
    %42 = arith.mulf %40, %41 : vector<8x128xf32>
    %43 = arith.addf %38, %42 : vector<8x128xf32>
    %44 = arith.mulf %43, %36 : vector<8x128xf32>
    %c1_i32 = arith.constant 1 : i32
    %45 = arith.muli %arg0, %c1_i32 : i32
    %46 = arith.addi %45, %arg1 : i32
    %47 = tpu.iota {dimensions = array<i32: 0>} : vector<8x128xi32>
    %48 = tpu.iota {dimensions = array<i32: 1>} : vector<8x128xi32>
    %c8_i32 = arith.constant 8 : i32
    %49 = arith.muli %46, %c8_i32 : i32
    %50 = vector.broadcast %49 : i32 to vector<8x128xi32>
    %51 = arith.addi %50, %47 : vector<8x128xi32>
    %c128_i32 = arith.constant 128 : i32
    %52 = vector.broadcast %c128_i32 : i32 to vector<8x128xi32>
    %53 = arith.muli %51, %52 : vector<8x128xi32>
    %54 = arith.addi %53, %48 : vector<8x128xi32>
    %c1024_i32 = arith.constant 1024 : i32
    %55 = vector.broadcast %c1024_i32 : i32 to vector<8x128xi32>
    %56 = arith.cmpi slt, %54, %55 : vector<8x128xi32>
    %cst_14 = arith.constant 0.000000e+00 : f32
    %57 = vector.broadcast %cst_14 : f32 to vector<8x128xf32>
    %58 = arith.select %56, %44, %57 : vector<8x128xi1>, vector<8x128xf32>
    %c0_15 = arith.constant 0 : index
    %c0_16 = arith.constant 0 : index
    %59 = vector.load %arg5[%c0_15, %c0_16] : memref<8x128xf32, #tpu.memory_space<vmem>>, vector<8x128xf32>
    %60 = vector.shape_cast %58 : vector<8x128xf32> to vector<1x8x128xf32>
    %cst_17 = arith.constant dense<0.000000e+00> : vector<8x128xf32>
    %61 = vector.multi_reduction <add>, %60, %cst_17 [0] : vector<1x8x128xf32> to vector<8x128xf32>
    %62 = arith.addf %59, %61 : vector<8x128xf32>
    %c0_18 = arith.constant 0 : index
    %c0_19 = arith.constant 0 : index
    %63 = vector.load %arg5[%c0_18, %c0_19] : memref<8x128xf32, #tpu.memory_space<vmem>>, vector<8x128xf32>
    tpu.vector_store %arg5[%c0_18, %c0_19], %62 {strides = array<i32>} : memref<8x128xf32, #tpu.memory_space<vmem>>, vector<8x128xf32>,
    %c0_i32_20 = arith.constant 0 : i32
    %64 = arith.cmpi eq, %arg1, %c0_i32_20 : i32
    %65 = arith.extui %64 : i1 to i32
    %c0_i32_21 = arith.constant 0 : i32
    %66 = arith.cmpi ne, %65, %c0_i32_21 : i32
    scf.if %66 {
      %c0_22 = arith.constant 0 : index
      %c0_23 = arith.constant 0 : index
      %67 = vector.load %arg5[%c0_22, %c0_23] : memref<8x128xf32, #tpu.memory_space<vmem>>, vector<8x128xf32>
      %c0_24 = arith.constant 0 : index
      %c0_25 = arith.constant 0 : index
      %c0_26 = arith.constant 0 : index
      %68 = vector.load %arg4[%c0_24, %c0_25, %c0_26] : memref<1x8x128xf32, #tpu.memory_space<vmem>>, vector<1x8x128xf32>
      %69 = vector.shape_cast %68 : vector<1x8x128xf32> to vector<8x128xf32>
      %70 = vector.shape_cast %67 : vector<8x128xf32> to vector<1x8x128xf32>
      tpu.vector_store %arg4[%c0_24, %c0_25, %c0_26], %70 {strides = array<i32>} : memref<1x8x128xf32, #tpu.memory_space<vmem>>, vector<1x8x128xf32>,
    } else {
    }
    return
  }
  func.func @transform_0(%arg0: i32, %arg1: i32) -> (i32, i32) {
    %c1_i32 = arith.constant 1 : i32
    %0 = arith.muli %arg0, %c1_i32 : i32
    %1 = arith.addi %0, %arg1 : i32
    %c0_i32 = arith.constant 0 : i32
    %c0_i32_0 = arith.constant 0 : i32
    return %1, %c0_i32 : i32, i32
  }
  func.func @transform_1(%arg0: i32, %arg1: i32) -> (i32, i32) {
    %c1_i32 = arith.constant 1 : i32
    %0 = arith.muli %arg0, %c1_i32 : i32
    %1 = arith.addi %0, %arg1 : i32
    %c0_i32 = arith.constant 0 : i32
    %c0_i32_0 = arith.constant 0 : i32
    return %1, %c0_i32 : i32, i32
  }
  func.func @transform_2(%arg0: i32, %arg1: i32) -> (i32, i32, i32) {
    %c0_i32 = arith.constant 0 : i32
    %c0_i32_0 = arith.constant 0 : i32
    %c0_i32_1 = arith.constant 0 : i32
    return %arg0, %c0_i32, %c0_i32_0 : i32, i32, i32
  }
}

</mosaic_0001>

<bundles_post_ra>
// kernel: tpu_custom_call.1
= control target key start
LH: loop header
LB: loop body
LE: loop exit
PB: predicated region body
PF: predicated region fallthrough
CT: control target
= control target key end

     0   :  { %7 = vsyncpa [#allocation4], 0  ;;  %s880_s0 = inlined_call_operand.hbm [shape: f32[16,128], index: 0, kind: input, shape index: {}]   ;;  %s881_s1 = inlined_call_operand.hbm [shape: f32[16,128], index: 1, kind: input, shape index: {}]   ;;  %s882_s2 = inlined_call_operand.hbm [shape: f32[2,8,128], index: 2, kind: output, shape index: {}]  }
   0x1   :  { %9 = vsyncpa [#allocation4 + $0x1], 0 }
   0x2   :  { %10 = vsyncpa [#allocation7], 0 }
   0x3   :  { %12 = vsyncpa [#allocation7 + $0x1], 0 }
   0x4   :  { %13 = vsyncpa [#allocation5], 0 }
   0x5   :  { %15 = vsyncpa [#allocation5 + $0x1], 0  ;;  %s654_s9 = smov 0   ;;  %s656_s10 = smov 0  }
   0x6   :  { %s658_s11 = smov 0   ;;  %s660_s12 = smov 0  }
   0x7   :  { %s662_s13 = smov 0   ;;  %s664_s14 = smov 0  }
   0x8 LB: > { %s398_s15 = sadd.s32 4294967295, %s634_s14   ;;  %s399_s16 = sadd.s32 4294967294, %s634_s14   ;;  %s634_s14 = sphi %s664_s14, %s21_s14   ;;  %s630_s13 = sphi %s662_s13, %s902_s13   ;;  %s626_s12 = sphi %s660_s12, %s901_s12   ;;  %s622_s11 = sphi %s658_s11, %s900_s11   ;;  %s618_s10 = sphi %s656_s10, %s899_s10   ;;  %s614_s9 = sphi %s654_s9, %s898_s9  }
   0x9   : > { %s33_s17 = sadd.s32 1, %s630_s13  ;;  %s42_s18 = sadd.s32 1, %s622_s11 }
   0xa   : > { %p35_p0 = scmp.ge.s32.totalorder %s33_s17, 2  ;;  %p49_p1 = scmp.ne.s32.totalorder %s622_s11, %s618_s10 }
   0xb   : > { %p50_p2 = scmp.eq.s32.totalorder %s634_s14, 0  ;;  %p55_p3 = scmp.ne.s32.totalorder %s618_s10, %s614_s9 }
   0xc   : > { %s904_s17 = smov (%p35_p0, %s33_s17), 0  ;;  %p56_p5 = scmp.eq.s32.totalorder %s398_s15, 0 }
   0xd   : > { %p695_p4 = por %p50_p2, %p49_p1  ;;  %s39_s20 = ssub.s32 %s630_s13, %s904_s17 }
   0xe   : > { %p107_p6 = scmp.eq.s32.totalorder %s398_s15, 1  ;;  %p40_p7 = scmp.eq.s32.totalorder %s39_s20, 0 }
   0xf   : > { %p701_p8 = por %p56_p5, %p55_p3  ;;  %p113_p10 = scmp.eq.s32.totalorder %s399_s16, 1 }
  0x10   : > { %p705_p9 = por %p107_p6, %p49_p1  ;;  %p432_p13 = scmp.lt.s32.totalorder %s634_s14, 2 }
  0x11   : > { %s886_s21 = scalar_select %p701_p8, 1, 0 }
  0x12   : > { %s887_s22 = scalar_select %p705_p9, 1, 0 }
  0x13   : > { %s710_s23 = scalar_select %p40_p7, %s622_s11, %s42_s18  }
  0x14   : > { %p712_p11 = por %p113_p10, %p55_p3  ;;  %s719_s25 = sand.u32 1, %s622_s11  }
  0x15   : > { %s402_s26 = sshll.u32 %s719_s25, 3  ;;  %s403_s27 = sshll.u32 %s630_s13, 7 }
  0x16   : > { %s888_s24 = scalar_select %p712_p11, 1, 0 }
  0x17   : > { %s728_s30 = scalar_lea.hbm %s880_s0, %s403_s27  ;;  %s137_s3 = scalar_lea.vmem [#allocation3], %s402_s26 }
  0x18   : > { %s145_s4 = sshll.u32 %s137_s3, 4  ;;  %p736_p0 = pnand %p432_p13, %p695_p4  ;;  %s732_s4 = int_to_ptr.vmem [resolvable:$true] %s145_s4 }
  0x19   : > { %s134_s6 = scalar_lea.sflag [#allocation4], %s719_s25  ;;  %s488_s7 = scalar_lea.hbm %s728_s30, 128 }
  0x1a   : > { %p489_p3 = scmp.ne.s32.totalorder %s728_s30, %s488_s7  ;;  %p490_p5 = pneg %p736_p0 }
  0x1b   : > { %s493_s16 = scalar_lea.hbm %s880_s0, 256  ;;  %p494_p4 = scmp.lt.u32.totalorder %s728_s30, %s880_s0 }
  0x1c   : > { %p491_p6 = pnand %p490_p5, %p489_p3  ;;  %p495_p10 = scmp.lt.u32.totalorder %s493_s16, %s488_s7 }
  0x1d   : > { %p497_p12 = scmp.lt.u32.totalorder %s488_s7, %s728_s30 }
  0x1e   : > { %p492_p7 = pneg %p491_p6  ;;  %p496_p13 = por %p495_p10, %p494_p4 }
  0x20   : > { %p498_p1 = por %p497_p12, %p496_p13 }
  0x22   : > { %p499_p2 = pnand %p498_p1, %p492_p7 }
  0x24   : > { %502 = shalt.err (!%p499_p2)
}
  0x25   : > { %s503_s20 = scalar_lea.vmem %s732_s4, 128  ;;  %s636_s28 = smov [#allocation3]  }
  0x26   : > { %p504_p3 = scmp.ne.s32.totalorder %s732_s4, %s503_s20  ;;  %s508_s29 = sshll.u32 %s636_s28, 4  ;;  %s509_s29 = int_to_ptr.vmem [resolvable:$false] %s508_s29 }
  0x27   : > { %s510_s3 = scalar_lea.vmem %s509_s29, 256  ;;  %p511_p9 = scmp.lt.s32.totalorder %s732_s4, %s509_s29 }
  0x28   : > { %p506_p6 = pnand %p504_p3, %p490_p5  ;;  %p512_p4 = scmp.lt.s32.totalorder %s510_s3, %s503_s20 }
  0x2a   : > { %p507_p11 = pneg %p506_p6  ;;  %p513_p10 = por %p512_p4, %p511_p9 }
  0x2c   : > { %p514_p12 = pnand %p513_p10, %p507_p11 }
  0x2e   : > { %517 = shalt.err (!%p514_p12)
}
  0x2f   : > { %424 = dma.hbm_to_vmem [thread:$0]  (!%p736_p0), %s728_s30, 128, %s732_s4, %s134_s6  }
  0x30   : > { %p890_p1 = scmp.lt.s32.totalorder %s634_s14, 3  ;;  %p891_p2 = scmp.ge.s32.totalorder %s634_s14, 1 }
  0x31   : > { %s781_s16 = scalar_lea.hbm %s881_s1, %s403_s27  ;;  %s156_s18 = scalar_lea.vmem [#allocation6], %s402_s26 }
  0x32   : > { %p772_p7 = pnand %p891_p2, %p890_p1  ;;  %s164_s19 = sshll.u32 %s156_s18, 4  ;;  %s165_s19 = int_to_ptr.vmem [resolvable:$true] %s164_s19 }
  0x33   : > { %s153_s30 = scalar_lea.sflag [#allocation7], %s719_s25  ;;  %s518_s4 = scalar_lea.hbm %s781_s16, 128 }
  0x34   : > { %s892_s7 = scalar_select %p772_p7, 1, 0 }
  0x35   : > { %p519_p9 = scmp.ne.s32.totalorder %s781_s16, %s518_s4  ;;  %s523_s27 = scalar_lea.hbm %s881_s1, 256 }
  0x36   : > { %p524_p3 = scmp.lt.u32.totalorder %s781_s16, %s881_s1  ;;  %p525_p6 = scmp.lt.u32.totalorder %s523_s27, %s518_s4 }
  0x37   : > { %p521_p11 = pnand %p519_p9, %p490_p5  ;;  %p527_p10 = scmp.lt.u32.totalorder %s518_s4, %s781_s16 }
  0x38   : > { %p526_p4 = por %p525_p6, %p524_p3 }
  0x39   : > { %p522_p13 = pneg %p521_p11 }
  0x3a   : > { %p528_p12 = por %p527_p10, %p526_p4 }
  0x3c   : > { %p529_p1 = pnand %p528_p12, %p522_p13 }
  0x3e   : > { %532 = shalt.err (!%p529_p1)
}
  0x3f   : > { %s533_s25 = scalar_lea.vmem %s165_s19, 128  ;;  %s637_s26 = smov [#allocation6]  }
  0x40   : > { %p534_p2 = scmp.ne.s32.totalorder %s165_s19, %s533_s25  ;;  %s538_s3 = sshll.u32 %s637_s26, 4  ;;  %s539_s3 = int_to_ptr.vmem [resolvable:$false] %s538_s3 }
  0x41   : > { %s540_s8 = scalar_lea.vmem %s539_s3, 256  ;;  %p541_p8 = scmp.lt.s32.totalorder %s165_s19, %s539_s3 }
  0x42   : > { %p536_p9 = pnand %p534_p2, %p490_p5  ;;  %p542_p7 = scmp.lt.s32.totalorder %s540_s8, %s533_s25 }
  0x44   : > { %p537_p11 = pneg %p536_p9  ;;  %p543_p3 = por %p542_p7, %p541_p8 }
  0x46   : > { %p544_p6 = pnand %p543_p3, %p537_p11 }
  0x48   : > { %547 = shalt.err (!%p544_p6)
}
  0x49   : > { %427 = dma.hbm_to_vmem [thread:$0]  (!%p736_p0), %s781_s16, 128, %s165_s19, %s153_s30  }
  0x4a   : > { %p893_p13 = scmp.ne.s32.totalorder %s892_s7, 0 }
  0x4b   : > { %s808_s15 = sand.u32 (!%p893_p13), 1, %s618_s10   ;;  %p894_p8 = scmp.ne.s32.totalorder (!%p893_p13), %s886_s21, 0 }
  0x4c   : > { %173 = sbr.rel (%p893_p13) target bundleno = 155 (0x9b), region = 28  ;;  %s811_s18 = sshll.u32 (!%p893_p13), %s808_s15, 3 }
  0x4d   : > { %s176_s4 = scalar_lea.sflag (!%p893_p13), [#allocation4], %s808_s15  ;;  %s179_s6 = scalar_lea.vmem (!%p893_p13), [#allocation3], %s811_s18 }
  0x53   : > { %601 = dma.done.wait (%p894_p8), %s176_s4, 128  }
  0x54   : > { %603 = vsyncadd (%p894_p8), %s176_s4, 4294967168  ;;  %s185_s5 = scalar_lea.sflag [#allocation7], %s808_s15  ;;  %s188_s7 = scalar_lea.vmem [#allocation6], %s811_s18 }
  0x55   : > { %605 = dma.done.wait (%p894_p8), %s185_s5, 128  }
  0x56   : > { %607 = vsyncadd (%p894_p8), %s185_s5, 4294967168  ;;  %v221_v0 = vld [vmem:[%s179_s6] sm:$0xff]  ;;  %v261_v9 = vlaneseq  ;;  %s410_s16 = sshll.u32 %s626_s12, 3  ;;  %v222_v11 = vld [vmem:[%s188_s7] sm:$0xff]  ;;  %s213_s21 = scalar_lea.vmem [#allocation8], %s811_s18 }
  0x57   : > { %v223_v1 = vand.u32 2147483647, %v221_v0  ;;  %vm245_vm0 = vcmp.ge.f32.partialorder %v221_v0, 0.0  ;;  %v266_v17 = vstv %s410_s16  ;;  %v227_v19 = vmax.f32 %v221_v0, 0.0  ;;  %s295_s19 = sshll.u32 %s213_s21, 4  ;;  %s412_s30 = sshll.u32 %s626_s12, 7  ;;  %s828_s19 = int_to_ptr.vmem [resolvable:$true] %s295_s19 }
  0x58   : > { %v262_v14 = vshrl.u32 %v261_v9, 7  ;;  %v228_v20 = vmul.f32 %v222_v11, %v221_v0  ;;  %v249_v21 = vsub.f32 1.0, %v222_v11  ;;  %v264_v31 = vand.u32 127, %v261_v9  ;;  %s833_s28 = scalar_lea.hbm %s882_s2, %s412_s30  ;;  %s282_s29 = scalar_lea.sflag [#allocation5], %s808_s15 }
  0x59   : > { %v224_v2 = vsub.f32 0.0, %v223_v1  ;;  %v256_v34 = vmul.f32 0.25, %v222_v11  ;;  %s548_s25 = scalar_lea.vmem %s828_s19, 128  ;;  %p895_p5 = scmp.ne.s32.totalorder %s887_s22, 0 }
  0x5a   : > { %v267_v25 = vadd.s32 %v266_v17, %v262_v14  ;;  %v229_v28 = vsub.f32 %v227_v19, %v228_v20  ;;  %v257_v35 = vmul.f32 0.75, %v249_v21  ;;  %p549_p0 = scmp.ne.s32.totalorder %s828_s19, %s548_s25  ;;  %s638_s12 = smov [#allocation8]  }
  0x5b   : > { %v225_v3 = vmul.f32 1.442695, %v224_v2  ;;  %s552_s26 = sshll.u32 %s638_s12, 4  ;;  %s553_s26 = int_to_ptr.vmem [resolvable:$false] %s552_s26 }
  0x5c   : > { %v268_v32 = vmul.u32 128, %v267_v25  ;;  %v258_v40 = vadd.f32 %v257_v35, %v256_v34  ;;  %p550_p7 = pnand %p549_p0, %p895_p5  ;;  %s554_s3 = scalar_lea.vmem %s553_s26, 256 }
  0x5d   : > { %482 = vpow2.f32 %v225_v3  ;;  %p555_p10 = scmp.lt.s32.totalorder %s828_s19, %s553_s26  ;;  %p556_p12 = scmp.lt.s32.totalorder %s554_s3, %s548_s25 }
  0x5e   : > { %v269_v38 = vadd.s32 %v268_v32, %v264_v31  ;;  %p551_p4 = pneg %p550_p7 }
  0x5f   : > { %p557_p1 = por %p556_p12, %p555_p10 }
  0x60   : > { %vm270_vm2 = vcmp.lt.s32.totalorder %v269_v38, 1024 }
  0x61   : > { %p558_p2 = pnand %p557_p1, %p551_p4 }
  0x67   : > { %v483_v4 = vpop.eup %482 }
  0x68   : > { %v230_v5 = vadd.f32 1.0, %v483_v4  ;;  %v233_v7 = vmul.f32 -0.5, %v483_v4  ;;  %v236_v16 = vand.u32 2147483647, %v483_v4 }
  0x6a   : > { %484 = vrcp.f32 %v230_v5  ;;  %v234_v12 = vadd.f32 1.0, %v233_v7  ;;  %vm237_vm1 = vcmp.lt.f32.partialorder %v236_v16, 0.0004427343 }
  0x6b   : > { %486 = vlog2.f32 %v230_v5 }
  0x6c   : > { %v235_v23 = vmul.f32 %v483_v4, %v234_v12 }
  0x74   : > { %v485_v6 = vpop.eup %484 }
  0x75   : > { %v242_v8 = vmul.f32 %v485_v6, %v230_v5  ;;  %v487_v15 = vpop.eup %486 }
  0x76   : > { %v232_v22 = vmul.f32 0.6931472, %v487_v15 }
  0x77   : > { %v243_v10 = vsub.f32 2.0, %v242_v8 }
  0x78   : > { %v238_v30 = vsel %vm237_vm1, %v235_v23, %v232_v22 }
  0x79   : > { %v244_v13 = vmul.f32 %v485_v6, %v243_v10  ;;  %v239_v36 = vadd.f32 %v238_v30, %v229_v28 }
  0x7b   : > { %v246_v18 = vmul.f32 %v483_v4, %v244_v13 }
  0x7d   : > { %v247_v24 = vsel %vm245_vm0, %v244_v13, %v246_v18 }
  0x7e   : > { %v248_v26 = vmul.f32 %v247_v24, %v222_v11  ;;  %v250_v27 = vsub.f32 1.0, %v247_v24 }
  0x80   : > { %v251_v29 = vmul.f32 %v250_v27, %v249_v21 }
  0x82   : > { %v252_v33 = vadd.f32 %v251_v29, %v248_v26 }
  0x84   : > { %v253_v37 = vsub.f32 1.0, %v252_v33 }
  0x86   : > { %v254_v39 = vmul.f32 %v253_v37, %v253_v37 }
  0x88   : > { %v255_v41 = vmul.f32 %v254_v39, %v239_v36 }
  0x8a   : > { %v259_v42 = vmul.f32 %v258_v40, %v255_v41 }
  0x8c   : > { %v271_v43 = vsel %vm270_vm2, %v259_v42, 0.0 }
  0x8d   : > { %280 = vst [vmem:[%s213_s21] sm:$0xff] %v271_v43 }
  0x8e   : > { %561 = shalt.err (!%p558_p2)
}
  0x8f   : > { %s562_s8 = scalar_lea.hbm %s833_s28, 128  ;;  %s566_s4 = scalar_lea.hbm %s882_s2, 256 }
  0x90   : > { %p563_p9 = scmp.ne.s32.totalorder %s833_s28, %s562_s8  ;;  %p567_p6 = scmp.lt.u32.totalorder %s833_s28, %s882_s2 }
  0x91   : > { %p568_p13 = scmp.lt.u32.totalorder %s566_s4, %s562_s8  ;;  %p570_p0 = scmp.lt.u32.totalorder %s562_s8, %s833_s28 }
  0x92   : > { %p564_p11 = pnand %p563_p9, %p895_p5 }
  0x93   : > { %p569_p8 = por %p568_p13, %p567_p6 }
  0x94   : > { %p565_p3 = pneg %p564_p11 }
  0x95   : > { %p571_p7 = por %p570_p0, %p569_p8 }
  0x97   : > { %p572_p4 = pnand %p571_p7, %p565_p3 }
  0x99   : > { %575 = shalt.err (!%p572_p4)
}
  0x9a   : > { %419 = dma.vmem_to_hbm [thread:$0]  (%p895_p5), %s828_s19, 128, %s833_s28, %s282_s29  }
  0x9b PF: > { %s307_s7 = sand.u32 1, %s614_s9   ;;  %p896_p10 = scmp.ne.s32.totalorder %s888_s24, 0 }
  0x9c   : > { %p897_p12 = scmp.ge.s32.totalorder %s634_s14, 2  ;;  %s308_s16 = scalar_lea.sflag [#allocation5], %s307_s7 }
  0x9e   : > { %p429_p1 = pnand %p897_p12, %p896_p10 }
  0xa0   : > { %609 = dma.done.wait (!%p429_p1), %s308_s16, 128  }
  0xa1   : > { %611 = vsyncadd (!%p429_p1), %s308_s16, 4294967168  ;;  %s21_s14 = sadd.s32 1, %s634_s14   ;;  %s898_s9 = smov %s618_s10 }
  0xa2   : > { %p18_p2 = scmp.ge.s32.totalorder %s21_s14, 4   ;;  %s899_s10 = smov %s622_s11 }
  0xa3   : > { %s900_s11 = smov %s710_s23  ;;  %s901_s12 = smov %s630_s13 }
  0xa4   : > { %s902_s13 = smov %s904_s17  ;;  %20 = sbr.rel (!%p18_p2) target bundleno = 8 (0x8), region = 94 }
  0xab   :  { %313 = vsyncpa [#allocation4], 1 }
  0xac   :  { %315 = vsyncpa [#allocation4 + $0x1], 1 }
  0xad   :  { %316 = vsyncpa [#allocation7], 1 }
  0xae   :  { %318 = vsyncpa [#allocation7 + $0x1], 1 }
  0xaf   :  { %319 = vsyncpa [#allocation5], 1 }
  0xb0   :  { %321 = vsyncpa [#allocation5 + $0x1], 1 }

</bundles_post_ra>
